<compile_context>
chip_gen: v7x
topology: tpu7x:2x2x1
jax: 0.10.0
libtpu: 0.0.40
codegen_flags: <defaults>
</compile_context>

<pallas_src>
import functools

import jax
import jax.numpy as jnp
from jax import lax
from jax.experimental import pallas as pl
from jax.experimental.pallas import tpu as pltpu


def _round_up(n, m):
    return ((n + m - 1) // m) * m


def _mlp_kernel(x_ref, w_in_ref, b_in_ref, w_h_ref, b_h_ref,
                w_out_ref, b_out_ref, o_ref, *, n_hidden, chain_rows):
    # Hoist all weight / bias loads out of the hidden loop (JAX does not CSE
    # the (1,width)->(rows,width) broadcast, so re-loading per iteration
    # wastes vld + VPU slots).
    w_in = w_in_ref[...]                 # (in_size, width)  bf16
    b_in = b_in_ref[...]                 # (1, width)        f32
    w_h = w_h_ref[...]                   # (width, width)    bf16
    b_h = b_h_ref[...]                   # (1, width)        f32
    w_out_row = w_out_ref[...]           # (1, width)        f32
    b_out = b_out_ref[0, 0]              # scalar (SMEM)     f32

    def input_layer(x):
        # bf16 operands on the MXU, f32 accumulate, f32 bias + tanh (EUP).
        return jnp.tanh(
            jnp.dot(x.astype(w_in.dtype), w_in,
                    preferred_element_type=jnp.float32) + b_in)

    def hidden_step(h):
        return jnp.tanh(
            jnp.dot(h.astype(w_h.dtype), w_h,
                    preferred_element_type=jnp.float32) + b_h)

    # Split the batch tile into independent row chains: the strictly serial
    # matmul -> tanh -> matmul dependency of one chain overlaps the other, so
    # MXU and EUP ping-pong instead of idling.  Offsets are static multiples
    # of 8 sublanes.
    offs = []
    off = 0
    for r in chain_rows:
        offs.append(off)
        off += r

    hs = tuple(input_layer(x_ref[pl.ds(o, r), :])
               for o, r in zip(offs, chain_rows))

    def step_all(_, hs):
        return tuple(hidden_step(h) for h in hs)

    if n_hidden <= 8:
        # Shallow: full static unroll gives the LLO scheduler maximum room.
        for _ in range(n_hidden):
            hs = step_all(None, hs)
    else:
        # Deep: bound code size / vreg live ranges, keep a small unroll.
        hs = lax.fori_loop(0, n_hidden, step_all, hs, unroll=2)

    # Output layer (width -> 1, no activation), emitted directly as a
    # lane-dense (1, rows) row: contract the width axis of both operands on
    # the MXU so the result lands with rows on lanes (no column transpose,
    # unmasked stores, dense writeback DMA).
    for h, o, r in zip(hs, offs, chain_rows):
        y = jnp.einsum("ow,rw->or", w_out_row, h,
                       preferred_element_type=jnp.float32)      # (1, r)
        o_ref[:, pl.ds(o, r)] = (y + b_out).astype(o_ref.dtype)


def tanh_nn_forward(x, params, *, depth, block_b=512):
    """Fused TanHNN forward pass with a batch-tiled Pallas kernel.

    x:      (B, input_size) float32
    params: dict with w_in (in, width) bf16, b_in (1, width) f32,
                      w_h (width, width) bf16, b_h (1, width) f32,
                      w_out_row (1, width) f32, b_out (1, 1) f32
    depth:  total depth as in the PyTorch module (hidden loop runs depth-2x)
    """
    n_hidden = max(depth - 2, 0)
    B, in_size = x.shape
    width = params["w_in"].shape[1]
    block_b = _round_up(block_b, 128)

    # Batch tile selection:
    #  * multiple of 8 sublanes; multiple of 128 whenever grid > 1 so the
    #    lane-dense (1, tb) output blocks stay layout-legal and unmasked,
    #  * at least 2 tiles when the batch allows it (v7x 2-TensorCore sharding),
    #  * large default so the ~0.35us per-grid-step overhead amortizes.
    if B <= 128:
        tb = max(8, _round_up(B, 8))                  # single tile
    elif B <= 2 * block_b:
        tb = _round_up(pl.cdiv(B, 2), 128)            # exactly two tiles
    else:
        tb = block_b
    grid_b = pl.cdiv(B, tb)
    rows = grid_b * tb

    # Two independent row chains per tile (MXU/EUP overlap); single chain for
    # tiny tiles where an 8-row-aligned split is not possible.
    if tb >= 16:
        r0 = (tb // 2) // 8 * 8
        chain_rows = (r0, tb - r0)
    else:
        chain_rows = (tb,)

    kernel = functools.partial(_mlp_kernel, n_hidden=n_hidden,
                               chain_rows=chain_rows)

    flops = 2 * rows * width * (in_size + n_hidden * width + 1)
    transcendentals = rows * width * (n_hidden + 1)
    bytes_accessed = (
        4 * B * in_size                               # x (f32)
        + 2 * (in_size * width + width * width)       # bf16 weights
        + 4 * (3 * width + 1)                         # f32 biases + out row
        + 4 * rows                                    # output
    )

    out = pl.pallas_call(
        kernel,
        # Lane-dense output: one (1, tb) row per tile, reshaped to (B, 1)
        # outside the kernel.  No wrapper-side jnp.pad of x: the ragged last
        # tile (if any) is handled by Pallas' block masking; garbage rows are
        # sliced off below and never contaminate valid rows.
        out_shape=jax.ShapeDtypeStruct((1, rows), jnp.float32),
        grid=(grid_b,),
        in_specs=[
            # x: tiled over the batch grid axis (double-buffered pipeline).
            pl.BlockSpec((tb, in_size), lambda i: (i, 0)),
            # Weights / biases: constant index_map -> stay VMEM-resident.
            pl.BlockSpec((in_size, width), lambda i: (0, 0)),
            pl.BlockSpec((1, width), lambda i: (0, 0)),
            pl.BlockSpec((width, width), lambda i: (0, 0)),
            pl.BlockSpec((1, width), lambda i: (0, 0)),
            pl.BlockSpec((1, width), lambda i: (0, 0)),
            # b_out: keep the scalar on the scalar path (SMEM).
            pl.BlockSpec(memory_space=pltpu.MemorySpace.SMEM),
        ],
        out_specs=pl.BlockSpec((1, tb), lambda i: (0, i)),
        compiler_params=pltpu.CompilerParams(
            dimension_semantics=("parallel",),    # shards tiles over v7x's 2 TCs
        ),
        cost_estimate=pl.CostEstimate(
            flops=flops,
            transcendentals=transcendentals,
            bytes_accessed=bytes_accessed,
        ),
    )(
        x,
        params["w_in"], params["b_in"],
        params["w_h"], params["b_h"],
        params["w_out_row"], params["b_out"],
    )

    return out[0, :B][:, None]


def init_params(key, input_size, width):
    """Deterministic init mimicking PyTorch nn.Linear (uniform +-1/sqrt(fan_in))."""
    k = jax.random.split(key, 6)

    def lin(kw, kb, fan_in, fan_out):
        bound = 1.0 / jnp.sqrt(jnp.float32(fan_in))
        w = jax.random.uniform(kw, (fan_in, fan_out), jnp.float32, -bound, bound)
        b = jax.random.uniform(kb, (1, fan_out), jnp.float32, -bound, bound)
        return w, b

    w_in, b_in = lin(k[0], k[1], input_size, width)
    w_h, b_h = lin(k[2], k[3], width, width)
    w_out, b_out = lin(k[4], k[5], width, 1)
    return {
        # MXU-facing weights in bf16 (bf16-native MXU on v5e/v6e/v7x);
        # biases and the output row stay f32 (f32 VPU/EUP path, v5e-safe).
        "w_in": w_in.astype(jnp.bfloat16), "b_in": b_in,
        "w_h": w_h.astype(jnp.bfloat16), "b_h": b_h,
        "w_out_row": w_out.T, "b_out": b_out,
    }


def reference_forward(x, params, *, depth):
    """Pure-JAX f32 reference mirroring the PyTorch forward."""
    w_in = params["w_in"].astype(jnp.float32)
    w_h = params["w_h"].astype(jnp.float32)
    h = jnp.tanh(x @ w_in + params["b_in"])
    for _ in range(max(depth - 2, 0)):
        h = jnp.tanh(h @ w_h + params["b_h"])
    return h @ params["w_out_row"].T + params["b_out"]


if __name__ == "__main__":
    key = jax.random.PRNGKey(0)

    configs = [
        # (batch, input_size, width, depth)
        (8, 16, 32, 4),     # single tile, single chain, static-unrolled hidden loop
        (256, 16, 32, 12),  # grid=2 (v7x sharding), dual chains, fori_loop, lane-dense rows
    ]
    for batch, input_size, width, depth in configs:
        key, kx, kp = jax.random.split(key, 3)
        x = jax.random.normal(kx, (batch, input_size), jnp.float32)
        params = init_params(kp, input_size, width)

        out = jax.block_until_ready(tanh_nn_forward(x, params, depth=depth))
        ref = reference_forward(x, params, depth=depth)

        assert out.shape == (batch, 1), out.shape
        max_diff = float(jnp.max(jnp.abs(out - ref)))
        # bf16 matmul operands -> loosened tolerance vs. the f32 reference.
        assert jnp.allclose(out, ref, atol=5e-2, rtol=5e-2), \
            f"max diff {max_diff}"

    print("KERNEL_OK")
</pallas_src>

<mosaic_0001>
module attributes {stable_mosaic.version = 11 : i64} {
  func.func @_mlp_kernel(%arg0: i32, %arg1: memref<8x16xf32, #tpu.memory_space<vmem>>, %arg2: memref<16x32xbf16, #tpu.memory_space<vmem>>, %arg3: memref<1x32xf32, #tpu.memory_space<vmem>>, %arg4: memref<32x32xbf16, #tpu.memory_space<vmem>>, %arg5: memref<1x32xf32, #tpu.memory_space<vmem>>, %arg6: memref<1x32xf32, #tpu.memory_space<vmem>>, %arg7: memref<1x1xf32, #tpu.memory_space<smem>>, %arg8: memref<1x8xf32, #tpu.memory_space<vmem>>) attributes {dimension_semantics = [#tpu.dimension_semantics<parallel>], iteration_bounds = array<i64: 1>, scalar_prefetch = 0 : i64, scratch_operands = 0 : i64, tpu.core_type = #tpu.core_type<tc>, window_params = [{transform_indices = @transform_0, window_bounds = array<i64: 8, 16>}, {pipeline_mode = #tpu.pipeline_mode<synchronous>, transform_indices = @transform_1, window_bounds = array<i64: 16, 32>}, {pipeline_mode = #tpu.pipeline_mode<synchronous>, transform_indices = @transform_2, window_bounds = array<i64: 1, 32>}, {pipeline_mode = #tpu.pipeline_mode<synchronous>, transform_indices = @transform_3, window_bounds = array<i64: 32, 32>}, {pipeline_mode = #tpu.pipeline_mode<synchronous>, transform_indices = @transform_4, window_bounds = array<i64: 1, 32>}, {pipeline_mode = #tpu.pipeline_mode<synchronous>, transform_indices = @transform_5, window_bounds = array<i64: 1, 32>}, {transform_indices = @transform_6, window_bounds = array<i64: 1, 1>}, {transform_indices = @transform_7, window_bounds = array<i64: 1, 8>}]} {
    %c0 = arith.constant 0 : index
    %c0_0 = arith.constant 0 : index
    %0 = vector.load %arg2[%c0, %c0_0] : memref<16x32xbf16, #tpu.memory_space<vmem>>, vector<16x32xbf16>
    %c0_1 = arith.constant 0 : index
    %c0_2 = arith.constant 0 : index
    %1 = vector.load %arg3[%c0_1, %c0_2] : memref<1x32xf32, #tpu.memory_space<vmem>>, vector<1x32xf32>
    %c0_3 = arith.constant 0 : index
    %c0_4 = arith.constant 0 : index
    %2 = vector.load %arg4[%c0_3, %c0_4] : memref<32x32xbf16, #tpu.memory_space<vmem>>, vector<32x32xbf16>
    %c0_5 = arith.constant 0 : index
    %c0_6 = arith.constant 0 : index
    %3 = vector.load %arg5[%c0_5, %c0_6] : memref<1x32xf32, #tpu.memory_space<vmem>>, vector<1x32xf32>
    %c0_7 = arith.constant 0 : index
    %c0_8 = arith.constant 0 : index
    %4 = vector.load %arg6[%c0_7, %c0_8] : memref<1x32xf32, #tpu.memory_space<vmem>>, vector<1x32xf32>
    %c0_9 = arith.constant 0 : index
    %c0_10 = arith.constant 0 : index
    %5 = memref.load %arg7[%c0_9, %c0_10] : memref<1x1xf32, #tpu.memory_space<smem>>
    %c0_11 = arith.constant 0 : index
    %c0_12 = arith.constant 0 : index
    %6 = vector.load %arg1[%c0_11, %c0_12] : memref<8x16xf32, #tpu.memory_space<vmem>>, vector<8x16xf32>
    %7 = arith.truncf %6 : vector<8x16xf32> to vector<8x16xbf16>
    %cst = arith.constant dense<0.000000e+00> : vector<8x32xf32>
    %8 = tpu.matmul %7, %0, %cst {dimension_numbers = #tpu.dot_dimension_numbers<[1], [0], [0], [1], [0, 0, 1, 1], [], []>} : vector<8x16xbf16>, vector<16x32xbf16>, vector<8x32xf32> -> vector<8x32xf32>
    %9 = vector.broadcast %1 : vector<1x32xf32> to vector<8x32xf32>
    %10 = arith.addf %8, %9 : vector<8x32xf32>
    %11 = math.tanh %10 : vector<8x32xf32>
    %12 = arith.truncf %11 : vector<8x32xf32> to vector<8x32xbf16>
    %cst_13 = arith.constant dense<0.000000e+00> : vector<8x32xf32>
    %13 = tpu.matmul %12, %2, %cst_13 {dimension_numbers = #tpu.dot_dimension_numbers<[1], [0], [0], [1], [0, 0, 1, 1], [], []>} : vector<8x32xbf16>, vector<32x32xbf16>, vector<8x32xf32> -> vector<8x32xf32>
    %14 = vector.broadcast %3 : vector<1x32xf32> to vector<8x32xf32>
    %15 = arith.addf %13, %14 : vector<8x32xf32>
    %16 = math.tanh %15 : vector<8x32xf32>
    %17 = arith.truncf %16 : vector<8x32xf32> to vector<8x32xbf16>
    %cst_14 = arith.constant dense<0.000000e+00> : vector<8x32xf32>
    %18 = tpu.matmul %17, %2, %cst_14 {dimension_numbers = #tpu.dot_dimension_numbers<[1], [0], [0], [1], [0, 0, 1, 1], [], []>} : vector<8x32xbf16>, vector<32x32xbf16>, vector<8x32xf32> -> vector<8x32xf32>
    %19 = vector.broadcast %3 : vector<1x32xf32> to vector<8x32xf32>
    %20 = arith.addf %18, %19 : vector<8x32xf32>
    %21 = math.tanh %20 : vector<8x32xf32>
    "tpu.trace_start"() <{level = 10 : i32, message = "ow,rw->or"}> : () -> ()
    %cst_15 = arith.constant dense<0.000000e+00> : vector<1x8xf32>
    %22 = tpu.matmul %4, %21, %cst_15 {dimension_numbers = #tpu.dot_dimension_numbers<[1], [1], [0], [0], [0, 0, 1, 0], [], []>} : vector<1x32xf32>, vector<8x32xf32>, vector<1x8xf32> -> vector<1x8xf32>
    "tpu.trace_stop"() : () -> ()
    %23 = vector.broadcast %5 : f32 to vector<1x8xf32>
    %24 = arith.addf %22, %23 : vector<1x8xf32>
    %c0_16 = arith.constant 0 : index
    %c0_17 = arith.constant 0 : index
    %25 = vector.load %arg8[%c0_16, %c0_17] : memref<1x8xf32, #tpu.memory_space<vmem>>, vector<1x8xf32>
    tpu.vector_store %arg8[%c0_16, %c0_17], %24 {strides = array<i32>} : memref<1x8xf32, #tpu.memory_space<vmem>>, vector<1x8xf32>,
    return
  }
  func.func @transform_0(%arg0: i32) -> (i32, i32) {
    %c0_i32 = arith.constant 0 : i32
    %c0_i32_0 = arith.constant 0 : i32
    return %arg0, %c0_i32 : i32, i32
  }
  func.func @transform_1(%arg0: i32) -> (i32, i32) {
    %c0_i32 = arith.constant 0 : i32
    %c0_i32_0 = arith.constant 0 : i32
    %c0_i32_1 = arith.constant 0 : i32
    return %c0_i32, %c0_i32_0 : i32, i32
  }
  func.func @transform_2(%arg0: i32) -> (i32, i32) {
    %c0_i32 = arith.constant 0 : i32
    %c0_i32_0 = arith.constant 0 : i32
    %c0_i32_1 = arith.constant 0 : i32
    return %c0_i32, %c0_i32_0 : i32, i32
  }
  func.func @transform_3(%arg0: i32) -> (i32, i32) {
    %c0_i32 = arith.constant 0 : i32
    %c0_i32_0 = arith.constant 0 : i32
    %c0_i32_1 = arith.constant 0 : i32
    return %c0_i32, %c0_i32_0 : i32, i32
  }
  func.func @transform_4(%arg0: i32) -> (i32, i32) {
    %c0_i32 = arith.constant 0 : i32
    %c0_i32_0 = arith.constant 0 : i32
    %c0_i32_1 = arith.constant 0 : i32
    return %c0_i32, %c0_i32_0 : i32, i32
  }
  func.func @transform_5(%arg0: i32) -> (i32, i32) {
    %c0_i32 = arith.constant 0 : i32
    %c0_i32_0 = arith.constant 0 : i32
    %c0_i32_1 = arith.constant 0 : i32
    return %c0_i32, %c0_i32_0 : i32, i32
  }
  func.func @transform_6(%arg0: i32) -> (i32, i32) {
    %c0_i32 = arith.constant 0 : i32
    %c0_i32_0 = arith.constant 0 : i32
    %c0_i32_1 = arith.constant 0 : i32
    return %c0_i32, %c0_i32_0 : i32, i32
  }
  func.func @transform_7(%arg0: i32) -> (i32, i32) {
    %c0_i32 = arith.constant 0 : i32
    %c0_i32_0 = arith.constant 0 : i32
    return %c0_i32, %arg0 : i32, i32
  }
}

</mosaic_0001>

<bundles_post_ra>
// kernel: tpu_custom_call.1
= control target key start
LH: loop header
LB: loop body
LE: loop exit
PB: predicated region body
PF: predicated region fallthrough
CT: control target
= control target key end

     0   :  { %13 = vsyncpa [#allocation4], 0  ;;  %s621_s0 = inlined_call_operand.hbm [shape: f32[8,16], index: 0, kind: input, shape index: {}]   ;;  %s622_s1 = inlined_call_operand.hbm [shape: bf16[16,32], index: 1, kind: input, shape index: {}]   ;;  %s623_s2 = inlined_call_operand.vmem [shape: f32[1,32], index: 2, kind: input, shape index: {}]   ;;  %s624_s3 = inlined_call_operand.hbm [shape: bf16[32,32], index: 3, kind: input, shape index: {}]   ;;  %s625_s4 = inlined_call_operand.vmem [shape: f32[1,32], index: 4, kind: input, shape index: {}]   ;;  %s626_s5 = inlined_call_operand.vmem [shape: f32[1,32], index: 5, kind: input, shape index: {}]   ;;  %s627_s6 = inlined_call_operand.<no memory space> [shape: f32[1,1], index: 6, kind: input, shape index: {}]   ;;  %s628_s7 = inlined_call_operand.hbm [shape: f32[1,8], index: 7, kind: output, shape index: {}]  }
   0x1   :  { %14 = vsyncpa [#allocation7], 0 }
   0x2   :  { %15 = vsyncpa [#allocation5], 0  ;;  %s499_s24 = smov [#allocation6]   ;;  %s405_s28 = scalar_lea.hbm %s622_s1, 128 }
   0x3   :  { %s31_s25 = sshll.u32 %s499_s24, 4  ;;  %p406_p0 = scmp.ne.s32.totalorder %s622_s1, %s405_s28  ;;  %s32_s25 = int_to_ptr.vmem [resolvable:$true] %s31_s25 }
   0x4   :  { %p409_p1 = scmp.lt.u32.totalorder %s405_s28, %s622_s1 }
   0x6   :  { %p411_p2 = pnand %p409_p1, %p406_p0 }
   0x8   :  { %414 = shalt.err (!%p411_p2)
}
   0x9   :  { %s415_s10 = scalar_lea.vmem %s32_s25, 128  ;;  %p420_p4 = scmp.lt.s32.totalorder %s32_s25, %s32_s25 }
   0xa   :  { %p416_p3 = scmp.ne.s32.totalorder %s32_s25, %s415_s10  ;;  %p421_p5 = scmp.lt.s32.totalorder %s415_s10, %s415_s10 }
   0xc   :  { %p422_p6 = por %p421_p5, %p420_p4 }
   0xe   :  { %p423_p7 = pnand %p422_p6, %p416_p3 }
  0x10   :  { %426 = shalt.err (!%p423_p7)
}
  0x11   :  { %s500_s11 = smov 64   ;;  %s501_s12 = smov 4  }
  0x12   :  { %37 = dma.hbm_to_vmem [thread:$0]  %s622_s1, 128, %s32_s25, [#allocation7], %s500_s11, %s500_s11, %s501_s12  }
  0x13   :  { %s502_s15 = smov [#allocation3]   ;;  %s503_s17 = smov [#allocation8]  }
  0x14   :  { %s22_s16 = sshll.u32 %s502_s15, 4  ;;  %s45_s18 = sshll.u32 %s503_s17, 4  ;;  %s23_s16 = int_to_ptr.vmem [resolvable:$true] %s22_s16  ;;  %s46_s18 = int_to_ptr.vmem [resolvable:$true] %s45_s18 }
  0x15   :  { %s427_s21 = scalar_lea.hbm %s621_s0, 128 }
  0x16   :  { %p428_p8 = scmp.ne.s32.totalorder %s621_s0, %s427_s21  ;;  %p431_p9 = scmp.lt.u32.totalorder %s427_s21, %s621_s0 }
  0x18   :  { %p433_p10 = pnand %p431_p9, %p428_p8 }
  0x1a   :  { %436 = shalt.err (!%p433_p10)
}
  0x1b   :  { %s437_s1 = scalar_lea.vmem %s23_s16, 128  ;;  %p442_p12 = scmp.lt.s32.totalorder %s23_s16, %s23_s16 }
  0x1c   :  { %p438_p11 = scmp.ne.s32.totalorder %s23_s16, %s437_s1  ;;  %p443_p13 = scmp.lt.s32.totalorder %s437_s1, %s437_s1 }
  0x1e   :  { %p444_p0 = por %p443_p13, %p442_p12 }
  0x20   :  { %p445_p1 = pnand %p444_p0, %p438_p11 }
  0x22   :  { %448 = shalt.err (!%p445_p1)
}
  0x23   :  { %25 = dma.hbm_to_vmem [thread:$0]  %s621_s0, 128, %s23_s16, [#allocation4]  }
  0x24   :  { %s449_s30 = scalar_lea.hbm %s624_s3, 256 }
  0x25   :  { %p450_p2 = scmp.ne.s32.totalorder %s624_s3, %s449_s30  ;;  %p453_p3 = scmp.lt.u32.totalorder %s449_s30, %s624_s3 }
  0x27   :  { %p455_p4 = pnand %p453_p3, %p450_p2 }
  0x29   :  { %458 = shalt.err (!%p455_p4)
}
  0x2a   :  { %s459_s14 = scalar_lea.vmem %s46_s18, 256  ;;  %p464_p6 = scmp.lt.s32.totalorder %s46_s18, %s46_s18 }
  0x2b   :  { %p460_p5 = scmp.ne.s32.totalorder %s46_s18, %s459_s14  ;;  %p465_p7 = scmp.lt.s32.totalorder %s459_s14, %s459_s14 }
  0x2d   :  { %p466_p8 = por %p465_p7, %p464_p6 }
  0x2f   :  { %p467_p9 = pnand %p466_p8, %p460_p5 }
  0x31   :  { %470 = shalt.err (!%p467_p9)
}
  0x32   :  { %51 = dma.hbm_to_vmem [thread:$0]  %s624_s3, 256, %s46_s18, [#allocation7], %s500_s11, %s500_s11, %s501_s12  }
  0x33   :  { %493 = dma.done.wait [#allocation4], 128  }
  0x34   :  { %494 = vsyncadd [#allocation4], 4294967168 }
  0x35   :  { %495 = dma.done.wait [#allocation7], 384  }
  0x36   :  { %496 = vsyncadd [#allocation7], 4294966912  ;;  %v504_v0 = vmov 0.0   ;;  %vm505_vm0 = vmmov 0   ;;  %v396_v1 = vld [vmem:[#allocation6] sm:$0xff]   ;;  %v78_v2 = vld [vmem:[#allocation3] sm:$0xff]  ;;  %v246_v29 = vstv %s627_s6 }
  0x37   :  { %361 = vmatprep.subr.bf16.mxu0 %v504_v0  ;;  %363 = vmatprep.mubr.msk.bf16.mxu0 %vm505_vm0, %v504_v0  ;;  %vm92_vm1 = vcmask 130048   ;;  %v79_v3 = vpack.c.bf16 %v78_v2, %v78_v2  ;;  %v397_v4 = vld [vmem:[#allocation8] sm:$0xff]   ;;  %v398_v5 = vld [vmem:[#allocation8 + $0x8] sm:$0xff]   ;;  %v341_v6 = vld [vmem:[%s623_s2] ss:$0 sm:$0xff]  ;;  %vm156_vm2 = vcmask 261120  }
  0x38   :  { %367 = vmatprep.subr.bf16.mxu1 %v504_v0  ;;  %371 = vmatprep.mubr.msk.bf16.mxu1 %vm505_vm0, %v504_v0  ;;  %v344_v14 = vld [vmem:[%s625_s4] ss:$0 sm:$0xff]  ;;  %s506_s19 = smov [#allocation9]   ;;  %vm323_vm3 = vcmask 57344  }
  0x39   :  { %362 = vmatpush3.bf16.msra.mxu0 %v396_v1  ;;  %368 = vmatpush3.bf16.msra.mxu1 %v397_v4  ;;  %v76_v28 = vld [vmem:[%s626_s5] sm:$0x1]  ;;  %s331_s20 = sshll.u32 %s506_s19, 4  ;;  %s332_s20 = int_to_ptr.vmem [resolvable:$true] %s331_s20 }
  0x3a   :  { %375 = vmatprep.subr.bf16.mxu0 %v504_v0  ;;  %369 = vmatprep.subr.bf16.mxu1 %v504_v0  ;;  %s471_s21 = scalar_lea.vmem %s332_s20, 16  ;;  %s475_s22 = scalar_lea.vmem %s332_s20, 32 }
  0x3b   :  { %p472_p10 = scmp.ne.s32.totalorder %s332_s20, %s471_s21  ;;  %p476_p11 = scmp.lt.s32.totalorder %s332_s20, %s332_s20 }
  0x3c   :  { %364 = vmatmul.mubr.msk.bf16.vlgmr.msra.gmra.mrb[0].mxu0 %vm92_vm1, %v79_v3  ;;  %p477_p12 = scmp.lt.s32.totalorder %s475_s22, %s471_s21 }
  0x3d   :  { %379 = vmatprep.mubr.msk.bf16.mxu0 %vm505_vm0, %v504_v0  ;;  %376 = vmatpush3.bf16.msra.mxu0 %v397_v4 }
  0x3e   :  { %377 = vmatprep.subr.bf16.mxu0 %v504_v0  ;;  %370 = vmatpush3.bf16.msra.mxu1 %v398_v5  ;;  %p478_p13 = por %p477_p12, %p476_p11 }
  0x3f   :  { %383 = vmatprep.subr.mxu1 %v504_v0 }
  0x40   :  { %p479_p0 = pnand %p478_p13, %p472_p10 }
  0x41   :  { %378 = vmatpush3.bf16.msra.mxu0 %v398_v5 }
 0x10f   :  { %v130_v7 = vpop.f32.mrb[0].mxu0 }
 0x110   :  { %v131_v8 = vadd.f32 %v341_v6, %v130_v7  ;;  %v365_v9 = vpop.f32.mrb[1].mxu0 }
 0x111   :  { %v133_v10 = vpop.f32.mrb[2].mxu0 }
 0x112   :  { %399 = vtanh.f32 %v131_v8  ;;  %v366_v11 = vpop.f32.mrb[3].mxu0 }
 0x11c   :  { %v400_v12 = vpop.eup %399 }
 0x11d   :  { %v137_v13 = vpack.c.bf16 %v400_v12, %v400_v12 }
 0x11f   :  { %372 = vmatmul.mubr.msk.bf16.vlgmr.msra.gmra.mrb[0].mxu1 %vm156_vm2, %v137_v13 }
 0x120   :  { %385 = vmatprep.mubr.msk.f32.mxu1 %vm505_vm0, %v504_v0 }
 0x1f2   :  { %v194_v15 = vpop.f32.mrb[0].mxu1 }
 0x1f3   :  { %v195_v16 = vadd.f32 %v344_v14, %v194_v15  ;;  %v373_v17 = vpop.f32.mrb[1].mxu1 }
 0x1f4   :  { %v197_v18 = vpop.f32.mrb[2].mxu1 }
 0x1f5   :  { %401 = vtanh.f32 %v195_v16  ;;  %v374_v19 = vpop.f32.mrb[3].mxu1 }
 0x1ff   :  { %v402_v20 = vpop.eup %401 }
 0x200   :  { %v201_v21 = vpack.c.bf16 %v402_v20, %v402_v20 }
 0x202   :  { %380 = vmatmul.mubr.msk.bf16.vlgmr.msra.gmra.mrb[4].mxu0 %vm156_vm2, %v201_v21 }
 0x2d5   :  { %v239_v22 = vpop.f32.mrb[4].mxu0 }
 0x2d6   :  { %v240_v23 = vadd.f32 %v344_v14, %v239_v22  ;;  %v381_v24 = vpop.f32.mrb[5].mxu0 }
 0x2d7   :  { %v242_v25 = vpop.f32.mrb[6].mxu0 }
 0x2d8   :  { %403 = vtanh.f32 %v240_v23  ;;  %v382_v26 = vpop.f32.mrb[7].mxu0 }
 0x2e2   :  { %v404_v27 = vpop.eup %403 }
 0x2e3   :  { %384 = vmatpush3.xpose.msk.msra.mxu1 %vm156_vm2, %v404_v27 }
 0x2e6   :  { %386 = vmatmul.mubr.msk.f32.vlgmr.msra.gmra.mrb[4].mxu1 %vm156_vm2, %v76_v28 }
 0x3b9   :  { %v319_v30 = vpop.f32.mrb[4].mxu1 }
 0x3ba   :  { %v320_v31 = vadd.f32 %v319_v30, %v246_v29  ;;  %v387_v32 = vpop.f32.mrb[5].mxu1 }
 0x3bc   :  { %324 = vst.msk [vmem:[#allocation9] sm:$0x1] %vm323_vm3, %v320_v31 }
 0x3bd   :  { %482 = shalt.err (!%p479_p0)
}
 0x3be   :  { %s483_s6 = scalar_lea.hbm %s628_s7, 16 }
 0x3bf   :  { %p484_p1 = scmp.ne.s32.totalorder %s628_s7, %s483_s6  ;;  %p487_p2 = scmp.lt.u32.totalorder %s483_s6, %s628_s7 }
 0x3c1   :  { %p489_p3 = pnand %p487_p2, %p484_p1 }
 0x3c3   :  { %492 = shalt.err (!%p489_p3)
}
 0x3c4   :  { %334 = dma.vmem_to_hbm [thread:$0]  %s332_s20, 16, %s628_s7, [#allocation5]  }
 0x3c5   :  { %497 = dma.done.wait [#allocation5], 16  }
 0x3c6   :  { %498 = vsyncadd [#allocation5], 4294967280 }
 0x3c7   :  { %338 = vsyncpa [#allocation4], 1 }
 0x3c8   :  { %339 = vsyncpa [#allocation7], 1 }
 0x3c9   :  { %340 = vsyncpa [#allocation5], 1 }

</bundles_post_ra>
